<compile_context>
chip_gen: v7x
topology: tpu7x:2x2x1
jax: 0.10.0
libtpu: 0.0.40
codegen_flags: <defaults>
</compile_context>

<pallas_src>
import math

import jax
import jax.numpy as jnp
from jax import lax
from jax.experimental import pallas as pl
from jax.experimental.pallas import tpu as pltpu

_INV_SQRT2 = 0.7071067811865476


def _gelu_exact_f32(h):
    # exact (erf-based) GELU on f32, matching torch.nn.GELU() default.
    return 0.5 * h * (1.0 + lax.erf(h * _INV_SQRT2))


# ---------------------------------------------------------------------------
# Variant 1: weights fully VMEM-resident, grid = (M_tiles,)
# ---------------------------------------------------------------------------
def _mlp_kernel_resident(x_ref, w1_ref, b1_ref, w2_ref, b2_ref, o_ref):
    # fc1: (tm, C) @ (C, H) -> f32 accumulate on the MXU
    h = jnp.dot(x_ref[...], w1_ref[...], preferred_element_type=jnp.float32)
    h = h + b1_ref[...].astype(jnp.float32)
    h = _gelu_exact_f32(h)
    # dropout (eval) = identity
    # fc2: (tm, H) @ (H, C) -> f32 accumulate; operands in weight dtype
    o = jnp.dot(h.astype(w2_ref.dtype), w2_ref[...],
                preferred_element_type=jnp.float32)
    o = o + b2_ref[...].astype(jnp.float32)
    o_ref[...] = o.astype(o_ref.dtype)


# ---------------------------------------------------------------------------
# Variant 2: hidden dim tiled, grid = (M_tiles, H_tiles), f32 accumulator
# ---------------------------------------------------------------------------
def _mlp_kernel_htiled(x_ref, w1_ref, b1_ref, w2_ref, b2_ref, o_ref, acc_ref):
    j = pl.program_id(1)

    @pl.when(j == 0)
    def _():
        acc_ref[...] = jnp.zeros_like(acc_ref)

    # fc1 partial: (tm, C) @ (C, th)
    h = jnp.dot(x_ref[...], w1_ref[...], preferred_element_type=jnp.float32)
    h = h + b1_ref[...].astype(jnp.float32)
    h = _gelu_exact_f32(h)
    # fc2 partial accumulate: (tm, th) @ (th, C)
    acc_ref[...] += jnp.dot(h.astype(w2_ref.dtype), w2_ref[...],
                            preferred_element_type=jnp.float32)

    @pl.when(j == pl.num_programs(1) - 1)
    def _():
        o_ref[...] = (acc_ref[...]
                      + b2_ref[...].astype(jnp.float32)).astype(o_ref.dtype)


# ---------------------------------------------------------------------------
# Tiling helpers
# ---------------------------------------------------------------------------
def _pick_tm(M, tm_max, dtype):
    sub = 16 if dtype == jnp.bfloat16 else 8
    if M <= tm_max:
        return M                        # block == full dim is always legal
    return max(sub, (tm_max // sub) * sub)


def _pick_th(H, th_max):
    if H <= th_max:
        return H
    best = None
    t = 128
    while t <= th_max:
        if H % t == 0:
            best = t
        t += 128
    return best if best is not None else H


def _clamp_vmem_limit(need_bytes):
    # Leave headroom over the tile footprint; stay safe on v7x (64 MiB VMEM).
    lim = int(need_bytes * 1.5) + (2 << 20)
    return max(16 * 1024 * 1024, min(64 * 1024 * 1024, lim))


def mlp_pallas(x, w1, b1, w2, b2, *, tm_max=256, th_max=2048,
               vmem_budget_bytes=40 * 1024 * 1024, force_h_tiling=False):
    """MLP forward: fc2(drop(gelu(fc1(x)))) with eval-mode (identity) dropout.

    x: (B, T, C). Weights pre-transposed (in, out): w1 (C, 4C), b1 (4C,),
    w2 (4C, C), b2 (C,).
    """
    B, T, C = x.shape
    H = w1.shape[1]
    M = B * T

    x2d = x.reshape(M, C)
    b1_2d = b1.reshape(1, H)
    b2_2d = b2.reshape(1, C)
    out_shape = jax.ShapeDtypeStruct((M, C), x.dtype)

    tm = _pick_tm(M, tm_max, x.dtype)
    isize = x.dtype.itemsize
    wsize = w1.dtype.itemsize

    # Worst-case VMEM footprint of the resident plan (double-buffered blocks).
    resident_bytes = (
        2 * tm * C * isize                        # x tile (double buffered)
        + 2 * tm * C * isize                      # out tile
        + 2 * (C * H + H + H * C + C) * wsize     # weights + biases
        + tm * H * 4                              # f32 fc1 intermediate
    )
    use_h_tiling = force_h_tiling or resident_bytes > vmem_budget_bytes

    if not use_h_tiling:
        grid_spec = pltpu.PrefetchScalarGridSpec(
            num_scalar_prefetch=0,
            grid=(pl.cdiv(M, tm),),
            in_specs=[
                pl.BlockSpec((tm, C), lambda i: (i, 0)),   # x rows, streamed
                pl.BlockSpec((C, H), lambda i: (0, 0)),    # w1 resident
                pl.BlockSpec((1, H), lambda i: (0, 0)),    # b1
                pl.BlockSpec((H, C), lambda i: (0, 0)),    # w2 resident
                pl.BlockSpec((1, C), lambda i: (0, 0)),    # b2
            ],
            out_specs=pl.BlockSpec((tm, C), lambda i: (i, 0)),
        )
        kernel = _mlp_kernel_resident
        dims = ("parallel",)
        need = resident_bytes
    else:
        th = _pick_th(H, th_max)
        grid_spec = pltpu.PrefetchScalarGridSpec(
            num_scalar_prefetch=0,
            grid=(pl.cdiv(M, tm), H // th),
            in_specs=[
                pl.BlockSpec((tm, C), lambda i, j: (i, 0)),  # x rows (constant over j)
                pl.BlockSpec((C, th), lambda i, j: (0, j)),  # w1 column slab
                pl.BlockSpec((1, th), lambda i, j: (0, j)),  # b1 slab
                pl.BlockSpec((th, C), lambda i, j: (j, 0)),  # w2 row slab
                pl.BlockSpec((1, C), lambda i, j: (0, 0)),   # b2 (constant)
            ],
            out_specs=pl.BlockSpec((tm, C), lambda i, j: (i, 0)),
            scratch_shapes=[pltpu.VMEM((tm, C), jnp.float32)],
        )
        kernel = _mlp_kernel_htiled
        dims = ("parallel", "arbitrary")
        need = (
            2 * tm * C * isize                    # x tile
            + 2 * tm * C * isize                  # out tile
            + 2 * (C * th + th + th * C + C) * wsize
            + tm * th * 4                         # f32 fc1 intermediate tile
            + tm * C * 4                          # f32 accumulator scratch
        )

    out2d = pl.pallas_call(
        kernel,
        out_shape=out_shape,
        grid_spec=grid_spec,
        compiler_params=pltpu.CompilerParams(
            dimension_semantics=dims,
            vmem_limit_bytes=_clamp_vmem_limit(need),
        ),
    )(x2d, w1, b1_2d, w2, b2_2d)

    return out2d.reshape(B, T, C)


# ---------------------------------------------------------------------------
# Init + reference
# ---------------------------------------------------------------------------
def init_params(key, n_embd, dtype=jnp.float32):
    """Deterministic init mimicking nn.Linear (uniform +/- 1/sqrt(fan_in))."""
    hidden = 4 * n_embd
    k1, k2, k3, k4 = jax.random.split(key, 4)
    bound1 = 1.0 / math.sqrt(n_embd)
    bound2 = 1.0 / math.sqrt(hidden)
    # stored pre-transposed: (in, out)
    w1 = jax.random.uniform(k1, (n_embd, hidden), jnp.float32, -bound1, bound1).astype(dtype)
    b1 = jax.random.uniform(k2, (hidden,), jnp.float32, -bound1, bound1).astype(dtype)
    w2 = jax.random.uniform(k3, (hidden, n_embd), jnp.float32, -bound2, bound2).astype(dtype)
    b2 = jax.random.uniform(k4, (n_embd,), jnp.float32, -bound2, bound2).astype(dtype)
    return w1, b1, w2, b2


def mlp_reference(x, w1, b1, w2, b2):
    xf = x.astype(jnp.float32)
    h = xf @ w1.astype(jnp.float32) + b1.astype(jnp.float32)
    h = 0.5 * h * (1.0 + lax.erf(h * _INV_SQRT2))
    return h @ w2.astype(jnp.float32) + b2.astype(jnp.float32)


if __name__ == "__main__":
    # small config: batch=2, seq=8, n_embd=64 (hidden = 256)
    B, T, C = 2, 8, 64
    key = jax.random.PRNGKey(0)
    kx, kp = jax.random.split(key)
    x = jax.random.normal(kx, (B, T, C), jnp.float32)
    w1, b1, w2, b2 = init_params(kp, C)
    ref = mlp_reference(x, w1, b1, w2, b2)

    # 1) resident-weights path (weights fit in VMEM), f32 operands.
    out = jax.block_until_ready(mlp_pallas(x, w1, b1, w2, b2))
    assert out.shape == (B, T, C)
    assert jnp.allclose(out, ref, atol=1e-4, rtol=1e-4), "f32 resident mismatch"

    # 2) H-tiled accumulator path (forced; th=128 -> 2 reduction steps), f32.
    out_t = jax.block_until_ready(
        mlp_pallas(x, w1, b1, w2, b2, force_h_tiling=True, th_max=128))
    assert jnp.allclose(out_t, ref, atol=1e-4, rtol=1e-4), "f32 H-tiled mismatch"

    # 3) bf16 fast path (MXU-native operands, f32 accumulation), resident.
    xb = x.astype(jnp.bfloat16)
    pb = tuple(p.astype(jnp.bfloat16) for p in (w1, b1, w2, b2))
    ref_b = mlp_reference(xb, *pb)
    out_b = jax.block_until_ready(mlp_pallas(xb, *pb))
    assert out_b.dtype == jnp.bfloat16
    assert jnp.allclose(out_b.astype(jnp.float32), ref_b, atol=5e-2, rtol=5e-2), \
        "bf16 resident mismatch"

    # 4) bf16 + H-tiled (the realistic large-model configuration).
    out_bt = jax.block_until_ready(
        mlp_pallas(xb, *pb, force_h_tiling=True, th_max=128))
    assert jnp.allclose(out_bt.astype(jnp.float32), ref_b, atol=5e-2, rtol=5e-2), \
        "bf16 H-tiled mismatch"

    print("KERNEL_OK")
</pallas_src>

<mosaic_0001>
module attributes {stable_mosaic.version = 11 : i64} {
  func.func @_mlp_kernel_resident(%arg0: i32, %arg1: memref<16x64xf32, #tpu.memory_space<vmem>>, %arg2: memref<64x256xf32, #tpu.memory_space<vmem>>, %arg3: memref<1x256xf32, #tpu.memory_space<vmem>>, %arg4: memref<256x64xf32, #tpu.memory_space<vmem>>, %arg5: memref<1x64xf32, #tpu.memory_space<vmem>>, %arg6: memref<16x64xf32, #tpu.memory_space<vmem>>) attributes {dimension_semantics = [#tpu.dimension_semantics<parallel>], iteration_bounds = array<i64: 1>, scalar_prefetch = 0 : i64, scratch_operands = 0 : i64, tpu.core_type = #tpu.core_type<tc>, window_params = [{transform_indices = @transform_0, window_bounds = array<i64: 16, 64>}, {pipeline_mode = #tpu.pipeline_mode<synchronous>, transform_indices = @transform_1, window_bounds = array<i64: 64, 256>}, {pipeline_mode = #tpu.pipeline_mode<synchronous>, transform_indices = @transform_2, window_bounds = array<i64: 1, 256>}, {pipeline_mode = #tpu.pipeline_mode<synchronous>, transform_indices = @transform_3, window_bounds = array<i64: 256, 64>}, {pipeline_mode = #tpu.pipeline_mode<synchronous>, transform_indices = @transform_4, window_bounds = array<i64: 1, 64>}, {transform_indices = @transform_5, window_bounds = array<i64: 16, 64>}]} {
    %c0 = arith.constant 0 : index
    %c0_0 = arith.constant 0 : index
    %0 = vector.load %arg1[%c0, %c0_0] : memref<16x64xf32, #tpu.memory_space<vmem>>, vector<16x64xf32>
    %c0_1 = arith.constant 0 : index
    %c0_2 = arith.constant 0 : index
    %1 = vector.load %arg2[%c0_1, %c0_2] : memref<64x256xf32, #tpu.memory_space<vmem>>, vector<64x256xf32>
    %cst = arith.constant dense<0.000000e+00> : vector<16x256xf32>
    %2 = tpu.matmul %0, %1, %cst {dimension_numbers = #tpu.dot_dimension_numbers<[1], [0], [0], [1], [0, 0, 1, 1], [], []>} : vector<16x64xf32>, vector<64x256xf32>, vector<16x256xf32> -> vector<16x256xf32>
    %c0_3 = arith.constant 0 : index
    %c0_4 = arith.constant 0 : index
    %3 = vector.load %arg3[%c0_3, %c0_4] : memref<1x256xf32, #tpu.memory_space<vmem>>, vector<1x256xf32>
    %4 = vector.broadcast %3 : vector<1x256xf32> to vector<16x256xf32>
    %5 = arith.addf %2, %4 : vector<16x256xf32>
    %cst_5 = arith.constant 5.000000e-01 : f32
    %6 = vector.broadcast %cst_5 : f32 to vector<16x256xf32>
    %7 = arith.mulf %6, %5 : vector<16x256xf32>
    %cst_6 = arith.constant 0.707106769 : f32
    %8 = vector.broadcast %cst_6 : f32 to vector<16x256xf32>
    %9 = arith.mulf %5, %8 : vector<16x256xf32>
    %10 = math.erf %9 : vector<16x256xf32>
    %cst_7 = arith.constant 1.000000e+00 : f32
    %11 = vector.broadcast %cst_7 : f32 to vector<16x256xf32>
    %12 = arith.addf %11, %10 : vector<16x256xf32>
    %13 = arith.mulf %7, %12 : vector<16x256xf32>
    %c0_8 = arith.constant 0 : index
    %c0_9 = arith.constant 0 : index
    %14 = vector.load %arg4[%c0_8, %c0_9] : memref<256x64xf32, #tpu.memory_space<vmem>>, vector<256x64xf32>
    %cst_10 = arith.constant dense<0.000000e+00> : vector<16x64xf32>
    %15 = tpu.matmul %13, %14, %cst_10 {dimension_numbers = #tpu.dot_dimension_numbers<[1], [0], [0], [1], [0, 0, 1, 1], [], []>} : vector<16x256xf32>, vector<256x64xf32>, vector<16x64xf32> -> vector<16x64xf32>
    %c0_11 = arith.constant 0 : index
    %c0_12 = arith.constant 0 : index
    %16 = vector.load %arg5[%c0_11, %c0_12] : memref<1x64xf32, #tpu.memory_space<vmem>>, vector<1x64xf32>
    %17 = vector.broadcast %16 : vector<1x64xf32> to vector<16x64xf32>
    %18 = arith.addf %15, %17 : vector<16x64xf32>
    %c0_13 = arith.constant 0 : index
    %c0_14 = arith.constant 0 : index
    %19 = vector.load %arg6[%c0_13, %c0_14] : memref<16x64xf32, #tpu.memory_space<vmem>>, vector<16x64xf32>
    tpu.vector_store %arg6[%c0_13, %c0_14], %18 {strides = array<i32>} : memref<16x64xf32, #tpu.memory_space<vmem>>, vector<16x64xf32>,
    return
  }
  func.func @transform_0(%arg0: i32) -> (i32, i32) {
    %c0_i32 = arith.constant 0 : i32
    %c0_i32_0 = arith.constant 0 : i32
    return %arg0, %c0_i32 : i32, i32
  }
  func.func @transform_1(%arg0: i32) -> (i32, i32) {
    %c0_i32 = arith.constant 0 : i32
    %c0_i32_0 = arith.constant 0 : i32
    %c0_i32_1 = arith.constant 0 : i32
    return %c0_i32, %c0_i32_0 : i32, i32
  }
  func.func @transform_2(%arg0: i32) -> (i32, i32) {
    %c0_i32 = arith.constant 0 : i32
    %c0_i32_0 = arith.constant 0 : i32
    %c0_i32_1 = arith.constant 0 : i32
    return %c0_i32, %c0_i32_0 : i32, i32
  }
  func.func @transform_3(%arg0: i32) -> (i32, i32) {
    %c0_i32 = arith.constant 0 : i32
    %c0_i32_0 = arith.constant 0 : i32
    %c0_i32_1 = arith.constant 0 : i32
    return %c0_i32, %c0_i32_0 : i32, i32
  }
  func.func @transform_4(%arg0: i32) -> (i32, i32) {
    %c0_i32 = arith.constant 0 : i32
    %c0_i32_0 = arith.constant 0 : i32
    %c0_i32_1 = arith.constant 0 : i32
    return %c0_i32, %c0_i32_0 : i32, i32
  }
  func.func @transform_5(%arg0: i32) -> (i32, i32) {
    %c0_i32 = arith.constant 0 : i32
    %c0_i32_0 = arith.constant 0 : i32
    return %arg0, %c0_i32 : i32, i32
  }
}

</mosaic_0001>

<bundles_post_ra>
// kernel: tpu_custom_call.1
= control target key start
LH: loop header
LB: loop body
LE: loop exit
PB: predicated region body
PF: predicated region fallthrough
CT: control target
= control target key end

     0   :  { %v412_v7 = vmov 0.0   ;;  %s618_s0 = inlined_call_operand.vmem [shape: f32[16,64], index: 0, kind: input, shape index: {}]   ;;  %s619_s1 = inlined_call_operand.vmem [shape: f32[64,256], index: 1, kind: input, shape index: {}]   ;;  %s620_s2 = inlined_call_operand.vmem [shape: f32[1,256], index: 2, kind: input, shape index: {}]   ;;  %s621_s3 = inlined_call_operand.vmem [shape: f32[256,64], index: 3, kind: input, shape index: {}]   ;;  %s622_s4 = inlined_call_operand.vmem [shape: f32[1,64], index: 4, kind: input, shape index: {}]   ;;  %s623_s5 = inlined_call_operand.hbm [shape: f32[16,64], index: 5, kind: output, shape index: {}]  }
   0x1   :  { %v24_v0 = vld [vmem:[%s619_s1 + $0x8] sm:$0xff]  ;;  %v26_v1 = vld [vmem:[%s619_s1 + $0x18] sm:$0xff]  ;;  %v23_v2 = vld [vmem:[%s619_s1] sm:$0xff]  ;;  %122 = vmatprep.mubr.f32.mxu0 %v412_v7 }
   0x2   :  { %v328_v3 = vpack.c.bf16 %v26_v1, %v24_v0  ;;  %v25_v4 = vld [vmem:[%s619_s1 + $0x10] sm:$0xff]  ;;  %v28_v5 = vld [vmem:[%s619_s1 + $0x28] sm:$0xff]  ;;  %v30_v6 = vld [vmem:[%s619_s1 + $0x38] sm:$0xff] }
   0x3   :  { %v330_v8 = vpack.c.bf16 %v25_v4, %v23_v2  ;;  %v332_v9 = vpack.c.bf16 %v30_v6, %v28_v5  ;;  %v27_v10 = vld [vmem:[%s619_s1 + $0x20] sm:$0xff]  ;;  %v29_v11 = vld [vmem:[%s619_s1 + $0x30] sm:$0xff]  ;;  %v32_v12 = vld [vmem:[%s619_s1 + $0x48] sm:$0xff] }
   0x4   :  { %329 = vmatprep.subr.bf16.mxu0 %v328_v3  ;;  %v34_v13 = vld [vmem:[%s619_s1 + $0x58] sm:$0xff]  ;;  %v334_v14 = vpack.c.bf16 %v29_v11, %v27_v10  ;;  %v31_v15 = vld [vmem:[%s619_s1 + $0x40] sm:$0xff]  ;;  %v33_v17 = vld [vmem:[%s619_s1 + $0x50] sm:$0xff] }
   0x5   :  { %331 = vmatpush1.bf16.msra.mxu0 %v330_v8  ;;  %v336_v16 = vpack.c.bf16 %v34_v13, %v32_v12  ;;  %v36_v18 = vld [vmem:[%s619_s1 + $0x68] sm:$0xff]  ;;  %v38_v19 = vld [vmem:[%s619_s1 + $0x78] sm:$0xff]  ;;  %v171_v20 = vld [vmem:[%s621_s3 + $0x80] sm:$0xff]  ;;  %v338_v27 = vpack.c.bf16 %v33_v17, %v31_v15 }
   0x6   :  { %333 = vmatprep.subr.bf16.mxu0 %v332_v9  ;;  %v172_v21 = vld [vmem:[%s621_s3 + $0x88] sm:$0xff]  ;;  %v155_v22 = vld [vmem:[%s621_s3] sm:$0xff]  ;;  %v173_v25 = vld [vmem:[%s621_s3 + $0x90] sm:$0xff]  ;;  %v340_v33 = vpack.c.bf16 %v38_v19, %v36_v18 }
   0x7   :  { %v344_v23 = vpack.c.bf16 %v172_v21, %v171_v20  ;;  %v156_v24 = vld [vmem:[%s621_s3 + $0x8] sm:$0xff]  ;;  %v174_v26 = vld [vmem:[%s621_s3 + $0x98] sm:$0xff]  ;;  %v157_v30 = vld [vmem:[%s621_s3 + $0x10] sm:$0xff] }
   0x8   :  { %v346_v28 = vpack.c.bf16 %v156_v24, %v155_v22  ;;  %v348_v29 = vpack.c.bf16 %v174_v26, %v173_v25  ;;  %v158_v31 = vld [vmem:[%s621_s3 + $0x18] sm:$0xff]  ;;  %v175_v32 = vld [vmem:[%s621_s3 + $0xa0] sm:$0xff]  ;;  %v37_v35 = vld [vmem:[%s619_s1 + $0x70] sm:$0xff] }
   0x9   :  { %335 = vmatpush1.bf16.msra.mxu0 %v334_v14  ;;  %v35_v34 = vld [vmem:[%s619_s1 + $0x60] sm:$0xff]  ;;  %345 = vmatprep.subr.bf16.mxu1 %v344_v23  ;;  %v176_v36 = vld [vmem:[%s621_s3 + $0xa8] sm:$0xff]  ;;  %v350_v37 = vpack.c.bf16 %v158_v31, %v157_v30 }
   0xa   :  { %337 = vmatprep.subr.bf16.mxu0 %v336_v16  ;;  %347 = vmatpush3.bf16.msra.mxu1 %v346_v28 }
   0xb   :  { %10 = vsyncpa [#allocation3], 0  ;;  %349 = vmatprep.subr.bf16.mxu1 %v348_v29  ;;  %v352_v38 = vpack.c.bf16 %v176_v36, %v175_v32  ;;  %v159_v39 = vld [vmem:[%s621_s3 + $0x20] sm:$0xff]  ;;  %v160_v40 = vld [vmem:[%s621_s3 + $0x28] sm:$0xff]  ;;  %v342_v41 = vpack.c.bf16 %v37_v35, %v35_v34  ;;  %vm51_vm0 = vcmask 523264   ;;  %v41_v11 = vlaneseq  ;;  %s413_s16 = smov [#allocation2]  }
   0xc   :  { %v354_v42 = vpack.c.bf16 %v160_v40, %v159_v39  ;;  %v21_v43 = vld [vmem:[%s618_s0] sm:$0xff]  ;;  %v22_v44 = vld [vmem:[%s618_s0 + $0x8] sm:$0xff]  ;;  %v177_v45 = vld [vmem:[%s621_s3 + $0xb0] sm:$0xff]  ;;  %s276_s17 = sshll.u32 %s413_s16, 4  ;;  %s277_s17 = int_to_ptr.vmem [resolvable:$true] %s276_s17 }
   0xd   :  { %339 = vmatpush1.bf16.msra.mxu0 %v338_v27  ;;  %v178_v46 = vld [vmem:[%s621_s3 + $0xb8] sm:$0xff]  ;;  %v161_v48 = vld [vmem:[%s621_s3 + $0x30] sm:$0xff]  ;;  %v179_v51 = vld [vmem:[%s621_s3 + $0xc0] sm:$0xff]  ;;  %v42_v12 = vshrl.u32 %v41_v11, 7  ;;  %s388_s18 = scalar_lea.vmem %s277_s17, 256  ;;  %p393_p1 = scmp.lt.s32.totalorder %s277_s17, %s277_s17 }
   0xe   :  { %341 = vmatprep.subr.bf16.mxu0 %v340_v33  ;;  %351 = vmatpush3.bf16.msra.mxu1 %v350_v37  ;;  %v356_v47 = vpack.c.bf16 %v178_v46, %v177_v45  ;;  %v162_v49 = vld [vmem:[%s621_s3 + $0x38] sm:$0xff]  ;;  %v180_v52 = vld [vmem:[%s621_s3 + $0xc8] sm:$0xff]  ;;  %v163_v54 = vld [vmem:[%s621_s3 + $0x40] sm:$0xff]  ;;  %p389_p0 = scmp.ne.s32.totalorder %s277_s17, %s388_s18  ;;  %p394_p2 = scmp.lt.s32.totalorder %s388_s18, %s388_s18 }
   0xf   :  { %353 = vmatprep.subr.bf16.mxu1 %v352_v38  ;;  %v358_v50 = vpack.c.bf16 %v162_v49, %v161_v48  ;;  %v360_v53 = vpack.c.bf16 %v180_v52, %v179_v51  ;;  %v164_v55 = vld [vmem:[%s621_s3 + $0x48] sm:$0xff]  ;;  %v181_v57 = vld [vmem:[%s621_s3 + $0xd0] sm:$0xff]  ;;  %v182_v58 = vld [vmem:[%s621_s3 + $0xd8] sm:$0xff]  ;;  %v43_v13 = vsub.s32 0, %v42_v12  ;;  %v47_v15 = vsub.s32 1, %v42_v12 }
  0x10   :  { %v362_v56 = vpack.c.bf16 %v164_v55, %v163_v54  ;;  %v364_v59 = vpack.c.bf16 %v182_v58, %v181_v57  ;;  %v165_v60 = vld [vmem:[%s621_s3 + $0x50] sm:$0xff]  ;;  %v166_v61 = vld [vmem:[%s621_s3 + $0x58] sm:$0xff]  ;;  %v183_v63 = vld [vmem:[%s621_s3 + $0xe0] sm:$0xff]  ;;  %p395_p3 = por %p394_p2, %p393_p1 }
  0x11   :  { %343 = vmatpush1.bf16.msra.mxu0 %v342_v41  ;;  %v366_v62 = vpack.c.bf16 %v166_v61, %v165_v60  ;;  %v184_v0 = vld [vmem:[%s621_s3 + $0xe8] sm:$0xff]  ;;  %v167_v2 = vld [vmem:[%s621_s3 + $0x60] sm:$0xff]  ;;  %v185_v5 = vld [vmem:[%s621_s3 + $0xf0] sm:$0xff] }
  0x12   :  { %355 = vmatpush3.bf16.msra.mxu1 %v354_v42  ;;  %v368_v1 = vpack.c.bf16 %v184_v0, %v183_v63  ;;  %v168_v3 = vld [vmem:[%s621_s3 + $0x68] sm:$0xff]  ;;  %v186_v6 = vld [vmem:[%s621_s3 + $0xf8] sm:$0xff]  ;;  %v169_v8 = vld [vmem:[%s621_s3 + $0x70] sm:$0xff]  ;;  %p396_p4 = pnand %p395_p3, %p389_p0 }
  0x13   :  { %357 = vmatprep.subr.bf16.mxu1 %v356_v47  ;;  %v370_v4 = vpack.c.bf16 %v168_v3, %v167_v2  ;;  %v170_v9 = vld [vmem:[%s621_s3 + $0x78] sm:$0xff]  ;;  %v39_v14 = vld [vmem:[%s620_s2] sm:$0x3] }
  0x14   :  { %287 = vmatmul.mubr.msk.f32.vlgmr.msra.gmra.mrb[0].mxu0 %vm51_vm0, %v21_v43  ;;  %v374_v10 = vpack.c.bf16 %v170_v9, %v169_v8  ;;  %v44_v16 = vrot.slane %v39_v14, %v43_v13  ;;  %v48_v17 = vrot.slane %v39_v14, %v47_v15  ;;  %v289_v47 = vld [vmem:[%s622_s4] ss:$0 sm:$0xff] }
  0x15   :  { %128 = vmatprep.mubr.f32.mxu0 %v412_v7  ;;  %v372_v7 = vpack.c.bf16 %v186_v6, %v185_v5 }
  0x16   :  { %359 = vmatpush3.bf16.msra.mxu1 %v358_v50 }
  0x17   :  { %361 = vmatprep.subr.bf16.mxu1 %v360_v53 }
  0x18   :  { %288 = vmatmul.mubr.msk.f32.gmra.mrb[2].mxu0 %vm51_vm0, %v22_v44 }
  0x1a   :  { %363 = vmatpush3.bf16.msra.mxu1 %v362_v56 }
  0x1b   :  { %365 = vmatprep.subr.bf16.mxu1 %v364_v59 }
  0x1e   :  { %367 = vmatpush3.bf16.msra.mxu1 %v366_v62 }
  0x1f   :  { %369 = vmatprep.subr.bf16.mxu1 %v368_v1 }
  0x22   :  { %371 = vmatpush3.bf16.msra.mxu1 %v370_v4 }
  0x23   :  { %373 = vmatprep.subr.bf16.mxu1 %v372_v7 }
  0x26   :  { %375 = vmatpush3.bf16.msra.mxu1 %v374_v10 }
  0xe7   :  { %v124_v18 = vpop.f32.mrb[0].mxu0 }
  0xe8   :  { %v125_v19 = vadd.f32 %v124_v18, %v44_v16  ;;  %v126_v20 = vpop.f32.mrb[1].mxu0 }
  0xe9   :  { %v127_v21 = vadd.f32 %v126_v20, %v48_v17 }
  0xea   :  { %v139_v22 = vmul.f32 0.70710677, %v125_v19  ;;  %v135_v35 = vmul.f32 0.5, %v125_v19 }
  0xeb   :  { %v140_v23 = vmul.f32 0.70710677, %v127_v21  ;;  %v130_v24 = vpop.f32.mrb[2].mxu0  ;;  %v136_v33 = vmul.f32 0.5, %v127_v21 }
  0xec   :  { %380 = verf.f32 %v139_v22  ;;  %v131_v25 = vadd.f32 %v130_v24, %v44_v16  ;;  %v132_v26 = vpop.f32.mrb[3].mxu0 }
  0xed   :  { %382 = verf.f32 %v140_v23  ;;  %v133_v27 = vadd.f32 %v132_v26, %v48_v17 }
  0xee   :  { %v141_v28 = vmul.f32 0.70710677, %v131_v25  ;;  %v137_v43 = vmul.f32 0.5, %v131_v25 }
  0xef   :  { %v142_v29 = vmul.f32 0.70710677, %v133_v27  ;;  %v138_v41 = vmul.f32 0.5, %v133_v27 }
  0xf0   :  { %384 = verf.f32 %v141_v28 }
  0xf1   :  { %386 = verf.f32 %v142_v29 }
  0xf6   :  { %v381_v30 = vpop.eup %380 }
  0xf7   :  { %v383_v31 = vpop.eup %382  ;;  %v147_v32 = vadd.f32 1.0, %v381_v30 }
  0xf8   :  { %v148_v34 = vadd.f32 1.0, %v383_v31 }
  0xf9   :  { %v151_v40 = vmul.f32 %v147_v32, %v135_v35 }
  0xfa   :  { %v385_v36 = vpop.eup %384  ;;  %v152_v37 = vmul.f32 %v148_v34, %v136_v33 }
  0xfb   :  { %v387_v38 = vpop.eup %386  ;;  %v149_v39 = vadd.f32 1.0, %v385_v36 }
  0xfc   :  { %v150_v42 = vadd.f32 1.0, %v387_v38  ;;  %258 = vmatprep.mubr.f32.mxu1 %v152_v37 }
  0xfd   :  { %259 = vmatmul.mubr.f32.vlgmr.msra.gmra.mrb[0].mxu1 %v151_v40  ;;  %v153_v45 = vmul.f32 %v149_v39, %v137_v43 }
  0xfe   :  { %v154_v44 = vmul.f32 %v150_v42, %v138_v41 }
 0x100   :  { %263 = vmatprep.mubr.f32.mxu1 %v154_v44 }
 0x101   :  { %264 = vmatmul.mubr.f32.gmra.mrb[2].mxu1 %v153_v45 }
 0x1d0   :  { %v322_v46 = vpop.f32.mrb[0].mxu1 }
 0x1d1   :  { %v323_v48 = vpop.f32.mrb[1].mxu1 }
 0x1d2   :  { %v324_v49 = vadd.f32 %v323_v48, %v322_v46 }
 0x1d4   :  { %v261_v50 = vadd.f32 %v324_v49, %v289_v47  ;;  %v325_v51 = vpop.f32.mrb[2].mxu1 }
 0x1d5   :  { %v326_v52 = vpop.f32.mrb[3].mxu1 }
 0x1d6   :  { %269 = vst.msk [vmem:[#allocation2] sm:$0xff] %vm51_vm0, %v261_v50  ;;  %v327_v53 = vadd.f32 %v326_v52, %v325_v51 }
 0x1d8   :  { %v266_v54 = vadd.f32 %v327_v53, %v289_v47 }
 0x1da   :  { %270 = vst.msk [vmem:[#allocation2 + $0x8] sm:$0xff] %vm51_vm0, %v266_v54 }
 0x1db   :  { %399 = shalt.err (!%p396_p4)
}
 0x1dc   :  { %s400_s20 = scalar_lea.hbm %s623_s5, 256 }
 0x1dd   :  { %p401_p5 = scmp.ne.s32.totalorder %s623_s5, %s400_s20  ;;  %p404_p6 = scmp.lt.u32.totalorder %s400_s20, %s623_s5 }
 0x1df   :  { %p406_p7 = pnand %p404_p6, %p401_p5 }
 0x1e1   :  { %409 = shalt.err (!%p406_p7)
}
 0x1e2   :  { %s414_s24 = smov 128   ;;  %s415_s25 = smov 8  }
 0x1e3   :  { %282 = dma.vmem_to_hbm [thread:$0]  %s277_s17, 256, %s623_s5, [#allocation3], %s414_s24, %s414_s24, %s415_s25  }
 0x1e4   :  { %410 = dma.done.wait [#allocation3], 256  }
 0x1e5   :  { %411 = vsyncadd [#allocation3], 4294967040 }
 0x1e6   :  { %286 = vsyncpa [#allocation3], 1 }

</bundles_post_ra>
